<compile_context>
chip_gen: v7x
topology: tpu7x:2x2x1
jax: 0.10.0
libtpu: 0.0.40
codegen_flags: <defaults>
</compile_context>

<pallas_src>
import math

import jax
import jax.numpy as jnp
from jax import lax
from jax.experimental import pallas as pl
from jax.experimental.pallas import tpu as pltpu

# ------------------------- model hyper-parameters (small) -------------------------
B = 2          # batch
S = 8          # sequence length
D = 32         # d_model
H = 4          # num_heads
DH = D // H    # dim per head
FF = 64        # dim_feedforward
EPS = 1e-6
NEG_INF = -1.0e9

BS = B * S         # tokens per call (rows of the activation slab)
R = B * H * S      # (head, batch, seq)-stacked rows for attention


def _layer_norm(z, w, b):
    """LayerNorm over the last dim (matches nn.LayerNorm(d_model, eps=1e-6)).

    var = E[x^2] - mu^2 keeps the two reductions independent (they overlap on the XLU);
    numerically safe here (f32, D=32, O(1) values)."""
    mu = jnp.mean(z, axis=-1, keepdims=True)
    ms = jnp.mean(z * z, axis=-1, keepdims=True)
    var = jnp.maximum(ms - mu * mu, 0.0)
    return (z - mu) * lax.rsqrt(var + EPS) * w + b


def encoder_layer_kernel(x_ref, bias_ref, wq_ref, wk_ref, wvo_ref,
                         ln1_w_ref, ln1_b_ref,
                         w1_ref, b1_ref, w2_ref, b2_ref,
                         ln2_w_ref, ln2_b_ref,
                         out_ref):
    # Everything is resident in VMEM; one invocation handles all batch elements & heads.
    x = x_ref[...]                                                     # (BS, D)

    # --- projections (scale folded into Wq; Wv@Wo fused per head into Wvo) ----------
    q = jnp.dot(x, wq_ref[...], preferred_element_type=jnp.float32)    # (BS, D)
    k = jnp.dot(x, wk_ref[...], preferred_element_type=jnp.float32)    # (BS, D)
    vo = jnp.dot(x, wvo_ref[...], preferred_element_type=jnp.float32)  # (BS, H*D)

    # --- stack all (head, batch, seq) blocks along sublanes (row order: h, b, s) -----
    q_s = jnp.concatenate([q[:, h * DH:(h + 1) * DH] for h in range(H)], axis=0)   # (R, DH)
    k_s = jnp.concatenate([k[:, h * DH:(h + 1) * DH] for h in range(H)], axis=0)   # (R, DH)
    vo_s = jnp.concatenate([vo[:, h * D:(h + 1) * D] for h in range(H)], axis=0)   # (R, D)

    # --- one (R, R) score matmul; block-diagonal validity + padding mask are a
    #     precomputed additive bias (off-block entries underflow to exactly 0 in exp) ---
    dn = (((1,), (1,)), ((), ()))       # contract last dims (q @ k^T, transpose-free)
    s_all = lax.dot_general(q_s, k_s, dimension_numbers=dn,
                            preferred_element_type=jnp.float32) + bias_ref[...]    # (R, R)

    # --- one numerically-stable softmax over 64-wide rows (exact denominator) --------
    m = jnp.max(s_all, axis=-1, keepdims=True)
    e = jnp.exp(s_all - m)
    p = e / jnp.sum(e, axis=-1, keepdims=True)

    # --- AV: rows already carry the per-head, post-Wo contribution -------------------
    ctx = jnp.dot(p, vo_s, preferred_element_type=jnp.float32)         # (R, D)

    # sum the H sublane blocks -> attention output (BS, D)
    attn = ctx[0:BS, :]
    for h in range(1, H):
        attn = attn + ctx[h * BS:(h + 1) * BS, :]

    # --- residual + LayerNorm 1 -------------------------------------------------------
    y = _layer_norm(attn + x, ln1_w_ref[...], ln1_b_ref[...])

    # --- FeedForward: Linear -> ReLU -> Linear ----------------------------------------
    h1 = jnp.dot(y, w1_ref[...], preferred_element_type=jnp.float32) + b1_ref[...]
    h1 = jnp.maximum(h1, 0.0)
    ffn = jnp.dot(h1, w2_ref[...], preferred_element_type=jnp.float32) + b2_ref[...]

    # --- residual + LayerNorm 2 -------------------------------------------------------
    out_ref[...] = _layer_norm(ffn + y, ln2_w_ref[...], ln2_b_ref[...]).astype(out_ref.dtype)


def transformer_encoder_layer(src, mask_bool, params):
    """src: (B, S, D) f32; mask_bool: (B, S, S) bool (True == masked)."""
    Bq, Sq, Dq = src.shape

    # ---- host-side one-time packing (tiny XLA ops) ----
    scale = 1.0 / math.sqrt(DH)
    wq = params["wq"] * scale                                        # fold 1/sqrt(DH)
    wk = params["wk"]
    # Fuse Wo into the value projection per head: Wvo_h = Wv[:, h] @ Wo[h, :]  -> (D, H*D)
    wvo = jnp.concatenate(
        [params["wv"][:, h * DH:(h + 1) * DH] @ params["wo"][h * DH:(h + 1) * DH, :]
         for h in range(H)], axis=1)

    # Additive bias over the (h, b, s)-stacked score matrix: valid iff same head, same
    # batch, and key position not padding-masked; everything else gets -1e9.
    r = jnp.arange(R)
    h_idx = r // (B * S)
    b_idx = (r % (B * S)) // S
    s_idx = r % S
    same_block = (h_idx[:, None] == h_idx[None, :]) & (b_idx[:, None] == b_idx[None, :])
    pad_masked = mask_bool[b_idx[:, None], s_idx[:, None], s_idx[None, :]]      # (R, R)
    bias = jnp.where(same_block & ~pad_masked, 0.0, NEG_INF).astype(jnp.float32)

    x2 = src.reshape(Bq * Sq, Dq)                                                # (BS, D)

    vmem_full = pl.BlockSpec(memory_space=pltpu.MemorySpace.VMEM)   # whole array in VMEM
    out2 = pl.pallas_call(
        encoder_layer_kernel,
        out_shape=jax.ShapeDtypeStruct((Bq * Sq, Dq), jnp.float32),
        in_specs=[vmem_full] * 13,
        out_specs=vmem_full,
    )(x2, bias, wq, wk, wvo,
      params["ln1_w"], params["ln1_b"],
      params["w1"], params["b1"], params["w2"], params["b2"],
      params["ln2_w"], params["ln2_b"])
    return out2.reshape(Bq, Sq, Dq)


# ------------------------------ parameter init -------------------------------------
def xavier_uniform(key, fan_in, fan_out):
    # matches nn.init.xavier_uniform_ for a (fan_out, fan_in) Linear weight,
    # returned already transposed to (fan_in, fan_out) for x @ W.
    bound = math.sqrt(6.0 / (fan_in + fan_out))
    return jax.random.uniform(key, (fan_in, fan_out), jnp.float32, -bound, bound)


def init_params(key):
    ks = jax.random.split(key, 6)
    return {
        "wq": xavier_uniform(ks[0], D, D),
        "wk": xavier_uniform(ks[1], D, D),
        "wv": xavier_uniform(ks[2], D, D),
        "wo": xavier_uniform(ks[3], D, D),
        "ln1_w": jnp.ones((1, D), jnp.float32),
        "ln1_b": jnp.zeros((1, D), jnp.float32),
        "w1": xavier_uniform(ks[4], D, FF),
        "b1": jnp.zeros((1, FF), jnp.float32),   # nn.init.constant_(bias, 0)
        "w2": xavier_uniform(ks[5], FF, D),
        "b2": jnp.zeros((1, D), jnp.float32),
        "ln2_w": jnp.ones((1, D), jnp.float32),
        "ln2_b": jnp.zeros((1, D), jnp.float32),
    }


# ------------------------------ pure-JAX reference ----------------------------------
def ref_forward(src, mask_bool, p):
    def ln(z, w, b):
        mu = jnp.mean(z, axis=-1, keepdims=True)
        var = jnp.mean((z - mu) ** 2, axis=-1, keepdims=True)
        return (z - mu) / jnp.sqrt(var + EPS) * w[0] + b[0]

    q = (src @ p["wq"]).reshape(B, S, H, DH).transpose(0, 2, 1, 3)
    k = (src @ p["wk"]).reshape(B, S, H, DH).transpose(0, 2, 1, 3)
    v = (src @ p["wv"]).reshape(B, S, H, DH).transpose(0, 2, 1, 3)
    scores = jnp.einsum("bhqd,bhkd->bhqk", q, k) / math.sqrt(DH)
    scores = jnp.where(mask_bool[:, None, :, :], NEG_INF, scores)
    attn = jax.nn.softmax(scores, axis=-1)
    o = jnp.einsum("bhqk,bhkd->bhqd", attn, v).transpose(0, 2, 1, 3).reshape(B, S, D)
    o = o @ p["wo"]
    x = ln(o + src, p["ln1_w"], p["ln1_b"])
    h1 = jnp.maximum(x @ p["w1"] + p["b1"][0], 0.0)
    f = h1 @ p["w2"] + p["b2"][0]
    return ln(f + x, p["ln2_w"], p["ln2_b"])


if __name__ == "__main__":
    key = jax.random.PRNGKey(0)
    kp, kx = jax.random.split(key)
    params = init_params(kp)

    src = jax.random.normal(kx, (B, S, D), jnp.float32)

    # Padding-style mask, explicitly broadcast to (B, S, S): batch 0 attends to all 8
    # keys, batch 1 only to the first 6.  True == masked.
    valid_len = jnp.array([8, 6], jnp.int32)
    key_idx = jnp.arange(S)[None, None, :]                                  # (1, 1, S)
    mask_bool = jnp.broadcast_to(key_idx >= valid_len[:, None, None], (B, S, S))

    out = transformer_encoder_layer(src, mask_bool, params)
    out = jax.block_until_ready(out)

    expected = ref_forward(src, mask_bool, params)
    assert out.shape == (B, S, D)
    max_err = jnp.max(jnp.abs(out - expected))
    assert jnp.allclose(out, expected, atol=1e-3, rtol=1e-3), f"max abs err {max_err}"

    print("KERNEL_OK")
</pallas_src>

<mosaic_0001>
module attributes {stable_mosaic.version = 11 : i64} {
  func.func @encoder_layer_kernel(%arg0: memref<16x32xf32, #tpu.memory_space<vmem>>, %arg1: memref<64x64xf32, #tpu.memory_space<vmem>>, %arg2: memref<32x32xf32, #tpu.memory_space<vmem>>, %arg3: memref<32x32xf32, #tpu.memory_space<vmem>>, %arg4: memref<32x128xf32, #tpu.memory_space<vmem>>, %arg5: memref<1x32xf32, #tpu.memory_space<vmem>>, %arg6: memref<1x32xf32, #tpu.memory_space<vmem>>, %arg7: memref<32x64xf32, #tpu.memory_space<vmem>>, %arg8: memref<1x64xf32, #tpu.memory_space<vmem>>, %arg9: memref<64x32xf32, #tpu.memory_space<vmem>>, %arg10: memref<1x32xf32, #tpu.memory_space<vmem>>, %arg11: memref<1x32xf32, #tpu.memory_space<vmem>>, %arg12: memref<1x32xf32, #tpu.memory_space<vmem>>, %arg13: memref<16x32xf32, #tpu.memory_space<vmem>>) attributes {dimension_semantics = [], scalar_prefetch = 0 : i64, scratch_operands = 0 : i64, tpu.core_type = #tpu.core_type<tc>} {
    %c0 = arith.constant 0 : index
    %c0_0 = arith.constant 0 : index
    %0 = vector.load %arg0[%c0, %c0_0] : memref<16x32xf32, #tpu.memory_space<vmem>>, vector<16x32xf32>
    %c0_1 = arith.constant 0 : index
    %c0_2 = arith.constant 0 : index
    %1 = vector.load %arg2[%c0_1, %c0_2] : memref<32x32xf32, #tpu.memory_space<vmem>>, vector<32x32xf32>
    %cst = arith.constant dense<0.000000e+00> : vector<16x32xf32>
    %2 = tpu.matmul %0, %1, %cst {dimension_numbers = #tpu.dot_dimension_numbers<[1], [0], [0], [1], [0, 0, 1, 1], [], []>} : vector<16x32xf32>, vector<32x32xf32>, vector<16x32xf32> -> vector<16x32xf32>
    %c0_3 = arith.constant 0 : index
    %c0_4 = arith.constant 0 : index
    %3 = vector.load %arg3[%c0_3, %c0_4] : memref<32x32xf32, #tpu.memory_space<vmem>>, vector<32x32xf32>
    %cst_5 = arith.constant dense<0.000000e+00> : vector<16x32xf32>
    %4 = tpu.matmul %0, %3, %cst_5 {dimension_numbers = #tpu.dot_dimension_numbers<[1], [0], [0], [1], [0, 0, 1, 1], [], []>} : vector<16x32xf32>, vector<32x32xf32>, vector<16x32xf32> -> vector<16x32xf32>
    %c0_6 = arith.constant 0 : index
    %c0_7 = arith.constant 0 : index
    %5 = vector.load %arg4[%c0_6, %c0_7] : memref<32x128xf32, #tpu.memory_space<vmem>>, vector<32x128xf32>
    %cst_8 = arith.constant dense<0.000000e+00> : vector<16x128xf32>
    %6 = tpu.matmul %0, %5, %cst_8 {dimension_numbers = #tpu.dot_dimension_numbers<[1], [0], [0], [1], [0, 0, 1, 1], [], []>} : vector<16x32xf32>, vector<32x128xf32>, vector<16x128xf32> -> vector<16x128xf32>
    %7 = vector.extract_strided_slice %2 {offsets = [0, 0], sizes = [16, 8], strides = [1, 1]} : vector<16x32xf32> to vector<16x8xf32>
    %8 = vector.extract_strided_slice %2 {offsets = [0, 8], sizes = [16, 8], strides = [1, 1]} : vector<16x32xf32> to vector<16x8xf32>
    %9 = vector.extract_strided_slice %2 {offsets = [0, 16], sizes = [16, 8], strides = [1, 1]} : vector<16x32xf32> to vector<16x8xf32>
    %10 = vector.extract_strided_slice %2 {offsets = [0, 24], sizes = [16, 8], strides = [1, 1]} : vector<16x32xf32> to vector<16x8xf32>
    %11 = tpu.concatenate %7, %8, %9, %10 in 0 : vector<16x8xf32>, vector<16x8xf32>, vector<16x8xf32>, vector<16x8xf32> -> vector<64x8xf32>
    %12 = vector.extract_strided_slice %4 {offsets = [0, 0], sizes = [16, 8], strides = [1, 1]} : vector<16x32xf32> to vector<16x8xf32>
    %13 = vector.extract_strided_slice %4 {offsets = [0, 8], sizes = [16, 8], strides = [1, 1]} : vector<16x32xf32> to vector<16x8xf32>
    %14 = vector.extract_strided_slice %4 {offsets = [0, 16], sizes = [16, 8], strides = [1, 1]} : vector<16x32xf32> to vector<16x8xf32>
    %15 = vector.extract_strided_slice %4 {offsets = [0, 24], sizes = [16, 8], strides = [1, 1]} : vector<16x32xf32> to vector<16x8xf32>
    %16 = tpu.concatenate %12, %13, %14, %15 in 0 : vector<16x8xf32>, vector<16x8xf32>, vector<16x8xf32>, vector<16x8xf32> -> vector<64x8xf32>
    %17 = vector.extract_strided_slice %6 {offsets = [0, 0], sizes = [16, 32], strides = [1, 1]} : vector<16x128xf32> to vector<16x32xf32>
    %18 = vector.extract_strided_slice %6 {offsets = [0, 32], sizes = [16, 32], strides = [1, 1]} : vector<16x128xf32> to vector<16x32xf32>
    %19 = vector.extract_strided_slice %6 {offsets = [0, 64], sizes = [16, 32], strides = [1, 1]} : vector<16x128xf32> to vector<16x32xf32>
    %20 = vector.extract_strided_slice %6 {offsets = [0, 96], sizes = [16, 32], strides = [1, 1]} : vector<16x128xf32> to vector<16x32xf32>
    %21 = tpu.concatenate %17, %18, %19, %20 in 0 : vector<16x32xf32>, vector<16x32xf32>, vector<16x32xf32>, vector<16x32xf32> -> vector<64x32xf32>
    %cst_9 = arith.constant dense<0.000000e+00> : vector<64x64xf32>
    %22 = tpu.matmul %11, %16, %cst_9 {dimension_numbers = #tpu.dot_dimension_numbers<[1], [1], [0], [0], [0, 0, 1, 0], [], []>} : vector<64x8xf32>, vector<64x8xf32>, vector<64x64xf32> -> vector<64x64xf32>
    %c0_10 = arith.constant 0 : index
    %c0_11 = arith.constant 0 : index
    %23 = vector.load %arg1[%c0_10, %c0_11] : memref<64x64xf32, #tpu.memory_space<vmem>>, vector<64x64xf32>
    %24 = arith.addf %22, %23 : vector<64x64xf32>
    %cst_12 = arith.constant dense<0xFF800000> : vector<64xf32>
    %25 = vector.multi_reduction <maximumf>, %24, %cst_12 [1] : vector<64x64xf32> to vector<64xf32>
    %26 = vector.shape_cast %25 : vector<64xf32> to vector<64x1xf32>
    %27 = vector.broadcast %26 : vector<64x1xf32> to vector<64x64xf32>
    %28 = arith.subf %24, %27 : vector<64x64xf32>
    %29 = math.exp %28 : vector<64x64xf32>
    %cst_13 = arith.constant dense<0.000000e+00> : vector<64xf32>
    %30 = vector.multi_reduction <add>, %29, %cst_13 [1] : vector<64x64xf32> to vector<64xf32>
    %31 = vector.shape_cast %30 : vector<64xf32> to vector<64x1xf32>
    %32 = vector.broadcast %31 : vector<64x1xf32> to vector<64x64xf32>
    %33 = arith.divf %29, %32 : vector<64x64xf32>
    %cst_14 = arith.constant dense<0.000000e+00> : vector<64x32xf32>
    %34 = tpu.matmul %33, %21, %cst_14 {dimension_numbers = #tpu.dot_dimension_numbers<[1], [0], [0], [1], [0, 0, 1, 1], [], []>} : vector<64x64xf32>, vector<64x32xf32>, vector<64x32xf32> -> vector<64x32xf32>
    %35 = vector.extract_strided_slice %34 {offsets = [0, 0], sizes = [16, 32], strides = [1, 1]} : vector<64x32xf32> to vector<16x32xf32>
    %36 = vector.extract_strided_slice %34 {offsets = [16, 0], sizes = [16, 32], strides = [1, 1]} : vector<64x32xf32> to vector<16x32xf32>
    %37 = arith.addf %35, %36 : vector<16x32xf32>
    %38 = vector.extract_strided_slice %34 {offsets = [32, 0], sizes = [16, 32], strides = [1, 1]} : vector<64x32xf32> to vector<16x32xf32>
    %39 = arith.addf %37, %38 : vector<16x32xf32>
    %40 = vector.extract_strided_slice %34 {offsets = [48, 0], sizes = [16, 32], strides = [1, 1]} : vector<64x32xf32> to vector<16x32xf32>
    %41 = arith.addf %39, %40 : vector<16x32xf32>
    %42 = arith.addf %41, %0 : vector<16x32xf32>
    %c0_15 = arith.constant 0 : index
    %c0_16 = arith.constant 0 : index
    %43 = vector.load %arg5[%c0_15, %c0_16] : memref<1x32xf32, #tpu.memory_space<vmem>>, vector<1x32xf32>
    %c0_17 = arith.constant 0 : index
    %c0_18 = arith.constant 0 : index
    %44 = vector.load %arg6[%c0_17, %c0_18] : memref<1x32xf32, #tpu.memory_space<vmem>>, vector<1x32xf32>
    %cst_19 = arith.constant dense<0.000000e+00> : vector<16xf32>
    %45 = vector.multi_reduction <add>, %42, %cst_19 [1] : vector<16x32xf32> to vector<16xf32>
    %46 = vector.shape_cast %45 : vector<16xf32> to vector<16x1xf32>
    %cst_20 = arith.constant 3.200000e+01 : f32
    %47 = vector.broadcast %cst_20 : f32 to vector<16x1xf32>
    %48 = arith.divf %46, %47 : vector<16x1xf32>
    %49 = arith.mulf %42, %42 : vector<16x32xf32>
    %cst_21 = arith.constant dense<0.000000e+00> : vector<16xf32>
    %50 = vector.multi_reduction <add>, %49, %cst_21 [1] : vector<16x32xf32> to vector<16xf32>
    %51 = vector.shape_cast %50 : vector<16xf32> to vector<16x1xf32>
    %cst_22 = arith.constant 3.200000e+01 : f32
    %52 = vector.broadcast %cst_22 : f32 to vector<16x1xf32>
    %53 = arith.divf %51, %52 : vector<16x1xf32>
    %54 = arith.mulf %48, %48 : vector<16x1xf32>
    %55 = arith.subf %53, %54 : vector<16x1xf32>
    %cst_23 = arith.constant 0.000000e+00 : f32
    %56 = vector.broadcast %cst_23 : f32 to vector<16x1xf32>
    %57 = arith.maximumf %55, %56 : vector<16x1xf32>
    %58 = vector.broadcast %48 : vector<16x1xf32> to vector<16x32xf32>
    %59 = arith.subf %42, %58 : vector<16x32xf32>
    %cst_24 = arith.constant 9.99999997E-7 : f32
    %60 = vector.broadcast %cst_24 : f32 to vector<16x1xf32>
    %61 = arith.addf %57, %60 : vector<16x1xf32>
    %62 = math.rsqrt %61 : vector<16x1xf32>
    %63 = vector.broadcast %62 : vector<16x1xf32> to vector<16x32xf32>
    %64 = arith.mulf %59, %63 : vector<16x32xf32>
    %65 = vector.broadcast %43 : vector<1x32xf32> to vector<16x32xf32>
    %66 = arith.mulf %64, %65 : vector<16x32xf32>
    %67 = vector.broadcast %44 : vector<1x32xf32> to vector<16x32xf32>
    %68 = arith.addf %66, %67 : vector<16x32xf32>
    %c0_25 = arith.constant 0 : index
    %c0_26 = arith.constant 0 : index
    %69 = vector.load %arg7[%c0_25, %c0_26] : memref<32x64xf32, #tpu.memory_space<vmem>>, vector<32x64xf32>
    %cst_27 = arith.constant dense<0.000000e+00> : vector<16x64xf32>
    %70 = tpu.matmul %68, %69, %cst_27 {dimension_numbers = #tpu.dot_dimension_numbers<[1], [0], [0], [1], [0, 0, 1, 1], [], []>} : vector<16x32xf32>, vector<32x64xf32>, vector<16x64xf32> -> vector<16x64xf32>
    %c0_28 = arith.constant 0 : index
    %c0_29 = arith.constant 0 : index
    %71 = vector.load %arg8[%c0_28, %c0_29] : memref<1x64xf32, #tpu.memory_space<vmem>>, vector<1x64xf32>
    %72 = vector.broadcast %71 : vector<1x64xf32> to vector<16x64xf32>
    %73 = arith.addf %70, %72 : vector<16x64xf32>
    %cst_30 = arith.constant 0.000000e+00 : f32
    %74 = vector.broadcast %cst_30 : f32 to vector<16x64xf32>
    %75 = arith.maximumf %73, %74 : vector<16x64xf32>
    %c0_31 = arith.constant 0 : index
    %c0_32 = arith.constant 0 : index
    %76 = vector.load %arg9[%c0_31, %c0_32] : memref<64x32xf32, #tpu.memory_space<vmem>>, vector<64x32xf32>
    %cst_33 = arith.constant dense<0.000000e+00> : vector<16x32xf32>
    %77 = tpu.matmul %75, %76, %cst_33 {dimension_numbers = #tpu.dot_dimension_numbers<[1], [0], [0], [1], [0, 0, 1, 1], [], []>} : vector<16x64xf32>, vector<64x32xf32>, vector<16x32xf32> -> vector<16x32xf32>
    %c0_34 = arith.constant 0 : index
    %c0_35 = arith.constant 0 : index
    %78 = vector.load %arg10[%c0_34, %c0_35] : memref<1x32xf32, #tpu.memory_space<vmem>>, vector<1x32xf32>
    %79 = vector.broadcast %78 : vector<1x32xf32> to vector<16x32xf32>
    %80 = arith.addf %77, %79 : vector<16x32xf32>
    %81 = arith.addf %80, %68 : vector<16x32xf32>
    %c0_36 = arith.constant 0 : index
    %c0_37 = arith.constant 0 : index
    %82 = vector.load %arg11[%c0_36, %c0_37] : memref<1x32xf32, #tpu.memory_space<vmem>>, vector<1x32xf32>
    %c0_38 = arith.constant 0 : index
    %c0_39 = arith.constant 0 : index
    %83 = vector.load %arg12[%c0_38, %c0_39] : memref<1x32xf32, #tpu.memory_space<vmem>>, vector<1x32xf32>
    %cst_40 = arith.constant dense<0.000000e+00> : vector<16xf32>
    %84 = vector.multi_reduction <add>, %81, %cst_40 [1] : vector<16x32xf32> to vector<16xf32>
    %85 = vector.shape_cast %84 : vector<16xf32> to vector<16x1xf32>
    %cst_41 = arith.constant 3.200000e+01 : f32
    %86 = vector.broadcast %cst_41 : f32 to vector<16x1xf32>
    %87 = arith.divf %85, %86 : vector<16x1xf32>
    %88 = arith.mulf %81, %81 : vector<16x32xf32>
    %cst_42 = arith.constant dense<0.000000e+00> : vector<16xf32>
    %89 = vector.multi_reduction <add>, %88, %cst_42 [1] : vector<16x32xf32> to vector<16xf32>
    %90 = vector.shape_cast %89 : vector<16xf32> to vector<16x1xf32>
    %cst_43 = arith.constant 3.200000e+01 : f32
    %91 = vector.broadcast %cst_43 : f32 to vector<16x1xf32>
    %92 = arith.divf %90, %91 : vector<16x1xf32>
    %93 = arith.mulf %87, %87 : vector<16x1xf32>
    %94 = arith.subf %92, %93 : vector<16x1xf32>
    %cst_44 = arith.constant 0.000000e+00 : f32
    %95 = vector.broadcast %cst_44 : f32 to vector<16x1xf32>
    %96 = arith.maximumf %94, %95 : vector<16x1xf32>
    %97 = vector.broadcast %87 : vector<16x1xf32> to vector<16x32xf32>
    %98 = arith.subf %81, %97 : vector<16x32xf32>
    %cst_45 = arith.constant 9.99999997E-7 : f32
    %99 = vector.broadcast %cst_45 : f32 to vector<16x1xf32>
    %100 = arith.addf %96, %99 : vector<16x1xf32>
    %101 = math.rsqrt %100 : vector<16x1xf32>
    %102 = vector.broadcast %101 : vector<16x1xf32> to vector<16x32xf32>
    %103 = arith.mulf %98, %102 : vector<16x32xf32>
    %104 = vector.broadcast %82 : vector<1x32xf32> to vector<16x32xf32>
    %105 = arith.mulf %103, %104 : vector<16x32xf32>
    %106 = vector.broadcast %83 : vector<1x32xf32> to vector<16x32xf32>
    %107 = arith.addf %105, %106 : vector<16x32xf32>
    %c0_46 = arith.constant 0 : index
    %c0_47 = arith.constant 0 : index
    %108 = vector.load %arg13[%c0_46, %c0_47] : memref<16x32xf32, #tpu.memory_space<vmem>>, vector<16x32xf32>
    tpu.vector_store %arg13[%c0_46, %c0_47], %107 {strides = array<i32>} : memref<16x32xf32, #tpu.memory_space<vmem>>, vector<16x32xf32>,
    return
  }
}

</mosaic_0001>

<bundles_post_ra>
// kernel: tpu_custom_call.1
= control target key start
LH: loop header
LB: loop body
LE: loop exit
PB: predicated region body
PF: predicated region fallthrough
CT: control target
= control target key end

     0   :  { %18 = vsyncpa [#allocation3], 0  ;;  %s2007_s0 = inlined_call_operand.hbm [shape: f32[16,32], index: 0, kind: input, shape index: {}]   ;;  %s2008_s1 = inlined_call_operand.vmem [shape: f32[64,64], index: 1, kind: input, shape index: {}]   ;;  %s2009_s2 = inlined_call_operand.vmem [shape: f32[32,32], index: 2, kind: input, shape index: {}]   ;;  %s2010_s3 = inlined_call_operand.hbm [shape: f32[32,32], index: 3, kind: input, shape index: {}]   ;;  %s2011_s4 = inlined_call_operand.hbm [shape: f32[32,128], index: 4, kind: input, shape index: {}]   ;;  %s2012_s5 = inlined_call_operand.vmem [shape: f32[1,32], index: 5, kind: input, shape index: {}]   ;;  %s2013_s6 = inlined_call_operand.vmem [shape: f32[1,32], index: 6, kind: input, shape index: {}]   ;;  %s2014_s7 = inlined_call_operand.hbm [shape: f32[32,64], index: 7, kind: input, shape index: {}]   ;;  %s2015_s8 = inlined_call_operand.hbm [shape: f32[1,64], index: 8, kind: input, shape index: {}]   ;;  %s2016_s9 = inlined_call_operand.vmem [shape: f32[64,32], index: 9, kind: input, shape index: {}]   ;;  %s2017_s10 = inlined_call_operand.vmem [shape: f32[1,32], index: 10, kind: input, shape index: {}]   ;;  %s2018_s11 = inlined_call_operand.vmem [shape: f32[1,32], index: 11, kind: input, shape index: {}]   ;;  %s2019_s12 = inlined_call_operand.vmem [shape: f32[1,32], index: 12, kind: input, shape index: {}]   ;;  %s2020_s13 = inlined_call_operand.hbm [shape: f32[16,32], index: 13, kind: output, shape index: {}]  }
   0x1   :  { %19 = vsyncpa [#allocation6], 0 }
   0x2   :  { %20 = vsyncpa [#allocation9], 0 }
   0x3   :  { %21 = vsyncpa [#allocation4], 0  ;;  %s1634_s25 = smov [#allocation5]   ;;  %s1635_s27 = smov [#allocation8]  }
   0x4   :  { %s43_s26 = sshll.u32 %s1634_s25, 4  ;;  %s71_s28 = sshll.u32 %s1635_s27, 4  ;;  %s44_s26 = int_to_ptr.vmem [resolvable:$true] %s43_s26  ;;  %s1718_s28 = int_to_ptr.vmem [resolvable:$true] %s71_s28 }
   0x5   :  { %s1494_s14 = scalar_lea.hbm %s2010_s3, 512 }
   0x6   :  { %p1495_p0 = scmp.ne.s32.totalorder %s2010_s3, %s1494_s14  ;;  %p1498_p1 = scmp.lt.u32.totalorder %s1494_s14, %s2010_s3 }
   0x8   :  { %p1500_p2 = pnand %p1498_p1, %p1495_p0 }
   0xa   :  { %1503 = shalt.err (!%p1500_p2)
}
   0xb   :  { %s1504_s19 = scalar_lea.vmem %s44_s26, 512  ;;  %p1509_p4 = scmp.lt.s32.totalorder %s44_s26, %s44_s26 }
   0xc   :  { %p1505_p3 = scmp.ne.s32.totalorder %s44_s26, %s1504_s19  ;;  %p1510_p5 = scmp.lt.s32.totalorder %s1504_s19, %s1504_s19 }
   0xe   :  { %p1511_p6 = por %p1510_p5, %p1509_p4 }
  0x10   :  { %p1512_p7 = pnand %p1511_p6, %p1505_p3 }
  0x12   :  { %1515 = shalt.err (!%p1512_p7)
}
  0x13   :  { %s1636_s20 = smov 128   ;;  %s1637_s21 = smov 8  }
  0x14   :  { %49 = dma.hbm_to_vmem [thread:$0]  %s2010_s3, 512, %s44_s26, [#allocation6], %s1636_s20, %s1636_s20, %s1637_s21  }
  0x15   :  { %s1516_s27 = scalar_lea.hbm %s2014_s7, 512 }
  0x16   :  { %p1517_p8 = scmp.ne.s32.totalorder %s2014_s7, %s1516_s27  ;;  %p1520_p9 = scmp.lt.u32.totalorder %s1516_s27, %s2014_s7 }
  0x18   :  { %p1522_p10 = pnand %p1520_p9, %p1517_p8 }
  0x1a   :  { %1525 = shalt.err (!%p1522_p10)
}
  0x1b   :  { %s1526_s16 = scalar_lea.vmem %s1718_s28, 512  ;;  %p1531_p12 = scmp.lt.s32.totalorder %s1718_s28, %s1718_s28 }
  0x1c   :  { %p1527_p11 = scmp.ne.s32.totalorder %s1718_s28, %s1526_s16  ;;  %p1532_p13 = scmp.lt.s32.totalorder %s1526_s16, %s1526_s16 }
  0x1e   :  { %p1533_p0 = por %p1532_p13, %p1531_p12 }
  0x20   :  { %p1534_p1 = pnand %p1533_p0, %p1527_p11 }
  0x22   :  { %1537 = shalt.err (!%p1534_p1)
}
  0x23   :  { %77 = dma.hbm_to_vmem [thread:$0]  %s2014_s7, 512, %s1718_s28, [#allocation9], %s1636_s20, %s1636_s20, %s1637_s21  }
  0x24   :  { %s1638_s17 = smov [#allocation2]   ;;  %s1639_s19 = smov [#allocation7]  }
  0x25   :  { %s27_s18 = sshll.u32 %s1638_s17, 4  ;;  %s55_s22 = sshll.u32 %s1639_s19, 4  ;;  %s28_s18 = int_to_ptr.vmem [resolvable:$true] %s27_s18  ;;  %s1755_s22 = int_to_ptr.vmem [resolvable:$true] %s55_s22 }
  0x26   :  { %s1538_s25 = scalar_lea.hbm %s2007_s0, 256 }
  0x27   :  { %p1539_p2 = scmp.ne.s32.totalorder %s2007_s0, %s1538_s25  ;;  %p1542_p3 = scmp.lt.u32.totalorder %s1538_s25, %s2007_s0 }
  0x29   :  { %p1544_p4 = pnand %p1542_p3, %p1539_p2 }
  0x2b   :  { %1547 = shalt.err (!%p1544_p4)
}
  0x2c   :  { %s1548_s7 = scalar_lea.vmem %s28_s18, 256  ;;  %p1553_p6 = scmp.lt.s32.totalorder %s28_s18, %s28_s18 }
  0x2d   :  { %p1549_p5 = scmp.ne.s32.totalorder %s28_s18, %s1548_s7  ;;  %p1554_p7 = scmp.lt.s32.totalorder %s1548_s7, %s1548_s7 }
  0x2f   :  { %p1555_p8 = por %p1554_p7, %p1553_p6 }
  0x31   :  { %p1556_p9 = pnand %p1555_p8, %p1549_p5 }
  0x33   :  { %1559 = shalt.err (!%p1556_p9)
}
  0x34   :  { %33 = dma.hbm_to_vmem [thread:$0]  %s2007_s0, 256, %s28_s18, [#allocation3], %s1636_s20, %s1636_s20, %s1637_s21  }
  0x35   :  { %s1560_s26 = scalar_lea.hbm %s2011_s4, 512 }
  0x36   :  { %p1561_p10 = scmp.ne.s32.totalorder %s2011_s4, %s1560_s26  ;;  %p1564_p11 = scmp.lt.u32.totalorder %s1560_s26, %s2011_s4 }
  0x38   :  { %p1566_p12 = pnand %p1564_p11, %p1561_p10 }
  0x3a   :  { %1569 = shalt.err (!%p1566_p12)
}
  0x3b   :  { %s1570_s25 = scalar_lea.vmem %s1755_s22, 512  ;;  %p1575_p0 = scmp.lt.s32.totalorder %s1755_s22, %s1755_s22 }
  0x3c   :  { %p1571_p13 = scmp.ne.s32.totalorder %s1755_s22, %s1570_s25  ;;  %p1576_p1 = scmp.lt.s32.totalorder %s1570_s25, %s1570_s25 }
  0x3e   :  { %p1577_p2 = por %p1576_p1, %p1575_p0 }
  0x40   :  { %p1578_p3 = pnand %p1577_p2, %p1571_p13 }
  0x42   :  { %1581 = shalt.err (!%p1578_p3)
}
  0x43   :  { %61 = dma.hbm_to_vmem [thread:$0]  %s2011_s4, 512, %s1755_s22, [#allocation6], %s1636_s20, %s1636_s20, %s1637_s21  }
  0x44   :  { %s1640_s27 = smov [#allocation10]   ;;  %s1582_s7 = scalar_lea.hbm %s2015_s8, 16 }
  0x45   :  { %s84_s29 = sshll.u32 %s1640_s27, 4  ;;  %p1583_p4 = scmp.ne.s32.totalorder %s2015_s8, %s1582_s7  ;;  %s85_s29 = int_to_ptr.vmem [resolvable:$true] %s84_s29 }
  0x46   :  { %p1586_p5 = scmp.lt.u32.totalorder %s1582_s7, %s2015_s8 }
  0x48   :  { %p1588_p6 = pnand %p1586_p5, %p1583_p4 }
  0x4a   :  { %1591 = shalt.err (!%p1588_p6)
}
  0x4b   :  { %s1592_s26 = scalar_lea.vmem %s85_s29, 16  ;;  %s1596_s4 = scalar_lea.vmem %s85_s29, 32 }
  0x4c   :  { %p1593_p7 = scmp.ne.s32.totalorder %s85_s29, %s1592_s26  ;;  %p1597_p8 = scmp.lt.s32.totalorder %s85_s29, %s85_s29 }
  0x4d   :  { %p1598_p9 = scmp.lt.s32.totalorder %s1596_s4, %s1592_s26 }
  0x4f   :  { %p1599_p10 = por %p1598_p9, %p1597_p8 }
  0x51   :  { %p1600_p11 = pnand %p1599_p10, %p1593_p7 }
  0x53   :  { %1603 = shalt.err (!%p1600_p11)
}
  0x54   :  { %87 = dma.hbm_to_vmem [thread:$0]  %s2015_s8, 16, %s85_s29, [#allocation9]  }
  0x55   :  { %1626 = dma.done.wait [#allocation3], 256  }
  0x56   :  { %1627 = vsyncadd [#allocation3], 4294967040 }
  0x57   :  { %1628 = dma.done.wait [#allocation6], 1024  }
  0x58   :  { %1629 = vsyncadd [#allocation6], 4294966272 }
  0x59   :  { %1630 = dma.done.wait [#allocation9], 528  }
  0x5a   :  { %1631 = vsyncadd [#allocation9], 4294966768  ;;  %vm117_vm0 = vcmask 261120   ;;  %v199_v0 = vld [vmem:[#allocation5] sm:$0xff]  ;;  %v200_v1 = vld [vmem:[#allocation5 + $0x8] sm:$0xff]  ;;  %vm413_vm1 = vcmask 64512  }
  0x5b   :  { %v201_v2 = vld [vmem:[#allocation5 + $0x10] sm:$0xff]  ;;  %v1324_v3 = vpack.c.bf16 %v200_v1, %v199_v0  ;;  %v202_v4 = vld [vmem:[#allocation5 + $0x18] sm:$0xff]  ;;  %v115_v9 = vld [vmem:[%s2009_s2 + $0x10] sm:$0xff]  ;;  %s1642_s29 = smov 120   ;;  %s1643_s30 = smov 112   ;;  %vm551_vm3 = vcmask 523264  }
  0x5c   :  { %v1804_v5 = vld [vmem:[#allocation2] sm:$0xff]  ;;  %v1328_v6 = vpack.c.bf16 %v202_v4, %v201_v2  ;;  %v114_v8 = vld [vmem:[%s2009_s2 + $0x8] sm:$0xff]  ;;  %v116_v11 = vld [vmem:[%s2009_s2 + $0x18] sm:$0xff]  ;;  %s1644_s18 = smov 96   ;;  %s1646_s27 = smov 64  }
  0x5d   :  { %1216 = vmatprep.mubr.msk.f32.mxu1 %vm117_vm0, %v1804_v5  ;;  %v113_v7 = vld [vmem:[%s2009_s2] sm:$0xff]  ;;  %1205 = vmatprep.mubr.msk.f32.mxu0 %vm117_vm0, %v1804_v5  ;;  %v1320_v12 = vpack.c.bf16 %v116_v11, %v115_v9  ;;  %v1822_v13 = vld [vmem:[#allocation2 + $0x8] sm:$0xff]  ;;  %vm1832_vm2 = vmpackc.low %vm413_vm1, %vm413_vm1  ;;  %s1641_s2 = smov 104  }
  0x5e   :  { %1325 = vmatprep.subr.bf16.mxu1 %v1324_v3  ;;  %v1316_v10 = vpack.c.bf16 %v114_v8, %v113_v7  ;;  %v278_v21 = vld [vmem:[#allocation7] sm:$0xff]  ;;  %v279_v22 = vld [vmem:[#allocation7 + $0x8] sm:$0xff]  ;;  %v280_v23 = vld [vmem:[#allocation7 + $0x10] sm:$0xff] }
  0x5f   :  { %1327 = vmatpush3.bf16.msra.mxu1 %v1324_v3  ;;  %v1332_v24 = vpack.c.bf16 %v279_v22, %v278_v21  ;;  %v281_v25 = vld [vmem:[#allocation7 + $0x18] sm:$0xff]  ;;  %v405_v50 = vld [vmem:[%s2008_s1] sm:$0xff]  ;;  %v408_v55 = vld [vmem:[%s2008_s1 + $0x18] sm:$0xff] }
  0x60   :  { %1329 = vmatprep.subr.bf16.mxu1 %v1328_v6  ;;  %1317 = vmatprep.subr.bf16.mxu0 %v1316_v10  ;;  %v1336_v26 = vpack.c.bf16 %v281_v25, %v280_v23  ;;  %v406_v49 = vld [vmem:[%s2008_s1 + $0x8] sm:$0xff]  ;;  %v407_v57 = vld [vmem:[%s2008_s1 + $0x10] sm:$0xff]  ;;  %v409_v0 = vld [vmem:[%s2008_s1 + $0x20] sm:$0xff] }
  0x61   :  { %1319 = vmatpush3.bf16.msra.mxu0 %v1316_v10  ;;  %v410_v63 = vld [vmem:[%s2008_s1 + $0x28] sm:$0xff]  ;;  %v412_v8 = vld [vmem:[%s2008_s1 + $0x38] sm:$0xff]  ;;  %v411_v9 = vld [vmem:[%s2008_s1 + $0x30] sm:$0xff]  ;;  %s1645_s1 = smov 32  }
  0x62   :  { %1321 = vmatprep.subr.bf16.mxu0 %v1320_v12 }
  0x63   :  { %1331 = vmatpush3.bf16.msra.mxu1 %v1328_v6 }
  0x65   :  { %1323 = vmatpush3.bf16.msra.mxu0 %v1320_v12 }
  0x66   :  { %1217 = vmatmul.mubr.msk.f32.vlgmr.msra.gmra.mrb[0].mxu1 %vm117_vm0, %v1822_v13  ;;  %1333 = vmatprep.subr.bf16.mxu0 %v1332_v24 }
  0x68   :  { %1206 = vmatmul.mubr.msk.f32.vlgmr.msra.gmra.mrb[0].mxu0 %vm117_vm0, %v1822_v13 }
  0x69   :  { %1227 = vmatprep.mubr.msk.f32.mxu0 %vm117_vm0, %v1804_v5  ;;  %1335 = vmatpush3.bf16.msra.mxu0 %v1332_v24 }
  0x6a   :  { %1337 = vmatprep.subr.bf16.mxu0 %v1336_v26 }
  0x6d   :  { %1339 = vmatpush3.bf16.msra.mxu0 %v1336_v26 }
  0x70   :  { %1228 = vmatmul.mubr.msk.f32.vlgmr.msra.gmra.mrb[2].mxu0 %vm117_vm0, %v1822_v13 }
 0x139   :  { %v1218_v14 = vpop.f32.mrb[0].mxu1 }
 0x13a   :  { %v269_v15 = vpop.f32.mrb[1].mxu1 }
 0x13b   :  { %v1340_v16 = vpack.c.bf16 %v1218_v14, %v269_v15  ;;  %v1434_v17 = vpack.i.bf16 %v1218_v14, %v269_v15  ;;  %v1207_v19 = vpop.f32.mrb[0].mxu0 }
 0x13c   :  { %v190_v20 = vpop.f32.mrb[1].mxu0 }
 0x13d   :  { %1435 = vrot.lane.b32.xlu1 %v1434_v17, %s1641_s2  ;;  %1425 = vrot.lane.b32.xlu0 %v1434_v17, %s1642_s29 }
 0x13e   :  { %1342 = vmatprep.subr.msk.bf16.mxu1 %vm1832_vm2, %v1340_v16  ;;  %1246 = vmatprep.mubr.msk.f32.mxu1 %vm413_vm1, %v190_v20 }
 0x13f   :  { %1345 = vmatpush3.bf16.xpose.msk.msra.mxu1 %vm1832_vm2, %v1340_v16 }
 0x141   :  { %1430 = vrot.lane.b32.xlu0 %v1434_v17, %s1643_s30  ;;  %359 = vrot.lane.b32.xlu1 %v190_v20, %s1642_s29 }
 0x143   :  { %v1229_v45 = vpop.f32.mrb[2].mxu0 }
 0x144   :  { %v348_v46 = vpop.f32.mrb[3].mxu0 }
 0x145   :  { %361 = vrot.lane.b32.xlu0 %v1207_v19, %s1642_s29  ;;  %363 = vrot.lane.b32.xlu1 %v190_v20, %s1643_s30  ;;  %v1862_v47 = vpack.i.bf16 %v1229_v45, %v348_v46  ;;  %v1364_v48 = vpack.c.bf16 %v1229_v45, %v348_v46 }
 0x147   :  { %1365 = vmatprep.subr.bf16.mxu0 %v1364_v48 }
 0x148   :  { %1367 = vmatpush3.bf16.msra.mxu0 %v1364_v48 }
 0x149   :  { %365 = vrot.lane.b32.xlu0 %v1207_v19, %s1643_s30  ;;  %367 = vrot.lane.b32.xlu1 %v190_v20, %s1641_s2 }
 0x14d   :  { %369 = vrot.lane.b32.xlu0 %v1207_v19, %s1641_s2  ;;  %s1647_s2 = smov [#allocation11]  }
 0x14e   :  { %s1077_s29 = sshll.u32 %s1647_s2, 4  ;;  %s1078_s29 = int_to_ptr.vmem [resolvable:$true] %s1077_s29 }
 0x14f   :  { %s1604_s30 = scalar_lea.vmem %s1078_s29, 256  ;;  %p1609_p13 = scmp.lt.s32.totalorder %s1078_s29, %s1078_s29 }
 0x150   :  { %p1605_p12 = scmp.ne.s32.totalorder %s1078_s29, %s1604_s30  ;;  %p1610_p0 = scmp.lt.s32.totalorder %s1604_s30, %s1604_s30 }
 0x152   :  { %p1611_p1 = por %p1610_p0, %p1609_p13 }
 0x154   :  { %p1612_p2 = pnand %p1611_p1, %p1605_p12 }
 0x1af   :  { %v1426_v27 = vpop.permute.xlu0 %1425  ;;  %v1436_v34 = vpop.permute.xlu1 %1435 }
 0x1b0   :  { %v1428_v28 = vunpack.i.h.bf16 %v1426_v27  ;;  %v1427_v29 = vunpack.i.l.bf16 %v1426_v27  ;;  %v1438_v36 = vunpack.i.h.bf16 %v1436_v34  ;;  %v1437_v37 = vunpack.i.l.bf16 %v1436_v34 }
 0x1b2   :  { %v1346_v30 = vpack.c.bf16 %v1428_v28, %v1427_v29  ;;  %v1358_v38 = vpack.c.bf16 %v1438_v36, %v1437_v37 }
 0x1b3   :  { %v1431_v31 = vpop.permute.xlu0 %1430  ;;  %v360_v39 = vpop.permute.xlu1 %359 }
 0x1b4   :  { %v1433_v32 = vunpack.i.h.bf16 %v1431_v31  ;;  %v1432_v33 = vunpack.i.l.bf16 %v1431_v31  ;;  %1348 = vmatprep.subr.msk.bf16.mxu1 %vm1832_vm2, %v1346_v30 }
 0x1b5   :  { %1351 = vmatpush3.bf16.xpose.msk.msra.mxu1 %vm1832_vm2, %v1346_v30 }
 0x1b6   :  { %v1352_v35 = vpack.c.bf16 %v1433_v32, %v1432_v33 }
 0x1b7   :  { %v362_v40 = vpop.permute.xlu0 %361  ;;  %v364_v41 = vpop.permute.xlu1 %363 }
 0x1b8   :  { %1354 = vmatprep.subr.msk.bf16.mxu1 %vm1832_vm2, %v1352_v35 }
 0x1bb   :  { %v366_v42 = vpop.permute.xlu0 %365  ;;  %v368_v43 = vpop.permute.xlu1 %367 }
 0x1bd   :  { %1357 = vmatpush3.bf16.xpose.msk.msra.mxu1 %vm1832_vm2, %v1352_v35 }
 0x1be   :  { %1360 = vmatprep.subr.msk.bf16.mxu1 %vm1832_vm2, %v1358_v38 }
 0x1bf   :  { %v370_v44 = vpop.permute.xlu0 %369 }
 0x1c5   :  { %1363 = vmatpush3.bf16.xpose.msk.msra.mxu1 %vm1832_vm2, %v1358_v38 }
 0x1cc   :  { %1247 = vmatmul.mubr.msk.f32.vlgmr.msra.gmra.mrb[2].mxu1 %vm413_vm1, %v1207_v19 }
 0x1cd   :  { %1249 = vmatprep.mubr.msk.f32.mxu1 %vm413_vm1, %v360_v39 }
 0x1d0   :  { %1250 = vmatmul.mubr.msk.f32.gmra.mrb[4].mxu1 %vm413_vm1, %v362_v40 }
 0x1d1   :  { %1252 = vmatprep.mubr.msk.f32.mxu1 %vm413_vm1, %v364_v41 }
 0x1d4   :  { %1253 = vmatmul.mubr.msk.f32.gmra.mrb[6].mxu1 %vm413_vm1, %v366_v42 }
 0x1d5   :  { %1255 = vmatprep.mubr.msk.f32.mxu1 %vm413_vm1, %v368_v43 }
 0x1d8   :  { %1256 = vmatmul.mubr.msk.f32.gmra.mrb[8].mxu1 %vm413_vm1, %v370_v44 }
 0x29f   :  { %v1248_v51 = vpop.f32.mrb[2].mxu1 }
 0x2a0   :  { %v518_v52 = vadd.f32 %v1248_v51, %v406_v49  ;;  %v512_v53 = vpop.f32.mrb[3].mxu1 }
 0x2a1   :  { %v513_v54 = vadd.f32 %v512_v53, %v405_v50 }
 0x2a2   :  { %v555_v56 = vsel %vm551_vm3, %v518_v52, -inf }
 0x2a3   :  { %556 = vmax.xlane.f32.xlu0 %v555_v56  ;;  %v1251_v58 = vpop.f32.mrb[4].mxu1  ;;  %v552_v59 = vsel %vm551_vm3, %v513_v54, -inf }
 0x2a4   :  { %v528_v60 = vadd.f32 %v1251_v58, %v408_v55  ;;  %v522_v61 = vpop.f32.mrb[5].mxu1  ;;  %553 = vmax.xlane.f32.xlu1 %v552_v59 }
 0x2a5   :  { %v523_v62 = vadd.f32 %v522_v61, %v407_v57 }
 0x2a6   :  { %v561_v1 = vsel %vm551_vm3, %v528_v60, -inf }
 0x2a7   :  { %v1254_v2 = vpop.f32.mrb[6].mxu1  ;;  %v558_v3 = vsel %vm551_vm3, %v523_v62, -inf }
 0x2a8   :  { %v538_v4 = vadd.f32 %v1254_v2, %v410_v63  ;;  %v532_v6 = vpop.f32.mrb[7].mxu1  ;;  %559 = vmax.xlane.f32.xlu0 %v558_v3  ;;  %562 = vmax.xlane.f32.xlu1 %v561_v1 }
 0x2a9   :  { %v533_v7 = vadd.f32 %v532_v6, %v409_v0 }
 0x2aa   :  { %v567_v10 = vsel %vm551_vm3, %v538_v4, -inf }
 0x2ab   :  { %v1257_v11 = vpop.f32.mrb[8].mxu1  ;;  %v564_v12 = vsel %vm551_vm3, %v533_v7, -inf }
 0x2ac   :  { %v1894_v14 = vadd.f32 %v1257_v11, %v412_v8  ;;  %v542_v15 = vpop.f32.mrb[9].mxu1  ;;  %565 = vmax.xlane.f32.xlu0 %v564_v12  ;;  %568 = vmax.xlane.f32.xlu1 %v567_v10 }
 0x2ad   :  { %v543_v16 = vadd.f32 %v542_v15, %v411_v9 }
 0x2ae   :  { %v573_v17 = vsel %vm551_vm3, %v1894_v14, -inf }
 0x2af   :  { %v570_v18 = vsel %vm551_vm3, %v543_v16, -inf }
 0x2b0   :  { %571 = vmax.xlane.f32.xlu0 %v570_v18  ;;  %574 = vmax.xlane.f32.xlu1 %v573_v17 }
 0x2c6   :  { %1440 = vrot.lane.b32.xlu0 %v1862_v47, %s1644_s18 }
 0x330   :  { %v557_v19 = vpop.xlane.xlu0 %556 }
 0x331   :  { %v577_v20 = vsub.f32 %v518_v52, %v557_v19  ;;  %v554_v21 = vpop.xlane.xlu1 %553 }
 0x332   :  { %v576_v22 = vsub.f32 %v513_v54, %v554_v21 }
 0x333   :  { %v586_v23 = vmul.f32 1.442695, %v577_v20 }
 0x334   :  { %v584_v24 = vmul.f32 1.442695, %v576_v22 }
 0x335   :  { %1454 = vpow2.f32 %v586_v23  ;;  %v560_v25 = vpop.xlane.xlu0 %559  ;;  %v563_v26 = vpop.xlane.xlu1 %562 }
 0x336   :  { %1456 = vpow2.f32 %v584_v24  ;;  %v578_v27 = vsub.f32 %v523_v62, %v560_v25  ;;  %v579_v28 = vsub.f32 %v528_v60, %v563_v26 }
 0x338   :  { %v588_v29 = vmul.f32 1.442695, %v578_v27  ;;  %v590_v30 = vmul.f32 1.442695, %v579_v28 }
 0x339   :  { %v566_v31 = vpop.xlane.xlu0 %565  ;;  %v569_v32 = vpop.xlane.xlu1 %568 }
 0x33a   :  { %1458 = vpow2.f32 %v588_v29  ;;  %v580_v33 = vsub.f32 %v533_v7, %v566_v31  ;;  %v581_v34 = vsub.f32 %v538_v4, %v569_v32 }
 0x33b   :  { %1460 = vpow2.f32 %v590_v30 }
 0x33c   :  { %v594_v35 = vmul.f32 1.442695, %v581_v34  ;;  %v592_v36 = vmul.f32 1.442695, %v580_v33 }
 0x33d   :  { %v572_v37 = vpop.xlane.xlu0 %571  ;;  %v575_v57 = vpop.xlane.xlu1 %574 }
 0x33e   :  { %1462 = vpow2.f32 %v594_v35  ;;  %v582_v55 = vsub.f32 %v543_v16, %v572_v37  ;;  %v583_v58 = vsub.f32 %v1894_v14, %v575_v57 }
 0x33f   :  { %v1900_v38 = vpop.eup %1454  ;;  %1464 = vpow2.f32 %v592_v36 }
 0x340   :  { %v1457_v39 = vpop.eup %1456  ;;  %v603_v40 = vsel %vm551_vm3, %v1900_v38, 0.0  ;;  %v596_v56 = vmul.f32 1.442695, %v582_v55  ;;  %v598_v59 = vmul.f32 1.442695, %v583_v58  ;;  %v927_v55 = vld [vmem:[%s2016_s9 + $0x28] sm:$0xff] }
 0x341   :  { %604 = vadd.xlane.f32.xlu1 %v603_v40  ;;  %v600_v41 = vsel %vm551_vm3, %v1457_v39, 0.0  ;;  %v1441_v42 = vpop.permute.xlu0 %1440 }
 0x342   :  { %601 = vadd.xlane.f32.xlu0 %v600_v41  ;;  %v1443_v43 = vunpack.i.h.bf16 %v1441_v42  ;;  %v1442_v44 = vunpack.i.l.bf16 %v1441_v42  ;;  %1466 = vpow2.f32 %v596_v56  ;;  %v828_v42 = vld [vmem:[#allocation8] sm:$0xff] }
 0x343   :  { %1468 = vpow2.f32 %v598_v59 }
 0x344   :  { %v1459_v45 = vpop.eup %1458  ;;  %v1368_v46 = vpack.c.bf16 %v1443_v43, %v1442_v44  ;;  %v829_v43 = vld [vmem:[#allocation8 + $0x8] sm:$0xff]  ;;  %v830_v44 = vld [vmem:[#allocation8 + $0x10] sm:$0xff] }
 0x345   :  { %v1905_v48 = vpop.eup %1460  ;;  %v606_v49 = vsel %vm551_vm3, %v1459_v45, 0.0 }
 0x346   :  { %v609_v50 = vsel %vm551_vm3, %v1905_v48, 0.0  ;;  %607 = vadd.xlane.f32.xlu0 %v606_v49  ;;  %1369 = vmatprep.subr.bf16.mxu0 %v1368_v46  ;;  %v923_v49 = vld [vmem:[%s2016_s9 + $0x8] sm:$0xff] }
 0x347   :  { %610 = vadd.xlane.f32.xlu1 %v609_v50  ;;  %1371 = vmatpush3.bf16.msra.mxu0 %v1368_v46  ;;  %v924_v50 = vld [vmem:[%s2016_s9 + $0x10] sm:$0xff] }
 0x348   :  { %v1910_v51 = vpop.eup %1462 }
 0x349   :  { %v615_v52 = vsel %vm551_vm3, %v1910_v51, 0.0  ;;  %v1465_v53 = vpop.eup %1464 }
 0x34a   :  { %v612_v54 = vsel %vm551_vm3, %v1465_v53, 0.0 }
 0x34b   :  { %616 = vadd.xlane.f32.xlu1 %v615_v52  ;;  %v925_v52 = vld [vmem:[%s2016_s9 + $0x18] sm:$0xff] }
 0x34c   :  { %v1467_v60 = vpop.eup %1466 }
 0x34d   :  { %v618_v61 = vsel %vm551_vm3, %v1467_v60, 0.0  ;;  %v1469_v62 = vpop.eup %1468 }
 0x34e   :  { %v621_v63 = vsel %vm551_vm3, %v1469_v62, 0.0 }
 0x34f   :  { %613 = vadd.xlane.f32.xlu1 %v612_v54  ;;  %v926_v54 = vld [vmem:[%s2016_s9 + $0x20] sm:$0xff] }
 0x350   :  { %v1396_v56 = vpack.c.bf16 %v927_v55, %v926_v54 }
 0x35c   :  { %1450 = vrot.lane.b32.xlu0 %v1862_v47, %s1645_s1 }
 0x360   :  { %1445 = vrot.lane.b32.xlu1 %v1862_v47, %s1646_s27 }
 0x37b   :  { %619 = vadd.xlane.f32.xlu0 %v618_v61 }
 0x384   :  { %622 = vadd.xlane.f32.xlu1 %v621_v63 }
 0x3ce   :  { %v605_v0 = vpop.xlane.xlu1 %604 }
 0x3cf   :  { %v602_v1 = vpop.xlane.xlu0 %601 }
 0x3d0   :  { %1470 = vrcp.f32 %v602_v1 }
 0x3d1   :  { %1472 = vrcp.f32 %v605_v0 }
 0x3d3   :  { %v608_v2 = vpop.xlane.xlu0 %607 }
 0x3d4   :  { %v611_v47 = vpop.xlane.xlu1 %610  ;;  %1474 = vrcp.f32 %v608_v2 }
 0x3d5   :  { %1476 = vrcp.f32 %v611_v47 }
 0x3d7   :  { %v1451_v8 = vpop.permute.xlu0 %1450 }
 0x3d8   :  { %v617_v3 = vpop.xlane.xlu1 %616  ;;  %v1453_v10 = vunpack.i.h.bf16 %v1451_v8  ;;  %v1452_v11 = vunpack.i.l.bf16 %v1451_v8 }
 0x3da   :  { %v1471_v4 = vpop.eup %1470  ;;  %v1376_v16 = vpack.c.bf16 %v1453_v10, %v1452_v11  ;;  %v1121_v11 = vld [vmem:[%s2012_s5] ss:$0 sm:$0xff] }
 0x3db   :  { %v625_v6 = vmul.f32 %v1471_v4, %v1457_v39  ;;  %v1473_v17 = vpop.eup %1472 }
 0x3dc   :  { %v614_v7 = vpop.xlane.xlu1 %613  ;;  %v627_v19 = vmul.f32 %v1473_v17, %v1900_v38 }
 0x3dd   :  { %1274 = vmatprep.mubr.msk.f32.mxu0 %vm551_vm3, %v625_v6  ;;  %1478 = vrcp.f32 %v614_v7 }
 0x3de   :  { %v1475_v18 = vpop.eup %1474  ;;  %1480 = vrcp.f32 %v617_v3 }
 0x3df   :  { %v629_v20 = vmul.f32 %v1475_v18, %v1459_v45  ;;  %v1477_v21 = vpop.eup %1476  ;;  %v831_v45 = vld [vmem:[#allocation8 + $0x18] sm:$0xff] }
 0x3e0   :  { %v1446_v9 = vpop.permute.xlu1 %1445  ;;  %v631_v23 = vmul.f32 %v1477_v21, %v1905_v48  ;;  %v1384_v46 = vpack.c.bf16 %v831_v45, %v830_v44  ;;  %v922_v48 = vld [vmem:[%s2016_s9] sm:$0xff] }
 0x3e1   :  { %v1448_v12 = vunpack.i.h.bf16 %v1446_v9  ;;  %v1447_v14 = vunpack.i.l.bf16 %v1446_v9 }
 0x3e3   :  { %v1372_v15 = vpack.c.bf16 %v1448_v12, %v1447_v14 }
 0x3e5   :  { %1373 = vmatprep.subr.bf16.mxu0 %v1372_v15 }
 0x3e6   :  { %1375 = vmatpush3.bf16.msra.mxu0 %v1372_v15 }
 0x3e7   :  { %1377 = vmatprep.subr.bf16.mxu0 %v1376_v16  ;;  %v1479_v22 = vpop.eup %1478 }
 0x3e8   :  { %v633_v24 = vmul.f32 %v1479_v22, %v1465_v53  ;;  %v1481_v25 = vpop.eup %1480  ;;  %v1392_v53 = vpack.c.bf16 %v925_v52, %v924_v50  ;;  %v928_v22 = vld [vmem:[%s2016_s9 + $0x30] sm:$0xff] }
 0x3e9   :  { %v635_v26 = vmul.f32 %v1481_v25, %v1910_v51  ;;  %v1388_v51 = vpack.c.bf16 %v923_v49, %v922_v48  ;;  %v1123_v25 = vld [vmem:[#allocation10] ss:$0 sm:$0xff] }
 0x3ea   :  { %1379 = vmatpush3.bf16.msra.mxu0 %v1376_v16  ;;  %v1122_v16 = vld [vmem:[%s2013_s6] ss:$0 sm:$0xff] }
 0x3eb   :  { %1389 = vmatprep.subr.bf16.mxu1 %v1388_v51 }
 0x3ec   :  { %1391 = vmatpush3.bf16.msra.mxu1 %v1388_v51 }
 0x3ed   :  { %1275 = vmatmul.mubr.msk.f32.vlgmr.msra.gmra.mrb[4].mxu0 %vm551_vm3, %v627_v19  ;;  %1393 = vmatprep.subr.bf16.mxu1 %v1392_v53 }
 0x3ee   :  { %1277 = vmatprep.mubr.msk.f32.mxu0 %vm551_vm3, %v629_v20 }
 0x3f0   :  { %1395 = vmatpush3.bf16.msra.mxu1 %v1392_v53 }
 0x3f1   :  { %1397 = vmatprep.subr.bf16.mxu1 %v1396_v56 }
 0x3f4   :  { %1399 = vmatpush3.bf16.msra.mxu1 %v1396_v56 }
 0x3f5   :  { %1278 = vmatmul.mubr.msk.f32.gmra.mrb[4].mxu0 %vm551_vm3, %v631_v23  ;;  %v929_v23 = vld [vmem:[%s2016_s9 + $0x38] sm:$0xff] }
 0x3f6   :  { %1280 = vmatprep.mubr.msk.f32.mxu0 %vm551_vm3, %v633_v24  ;;  %v1400_v24 = vpack.c.bf16 %v929_v23, %v928_v22 }
 0x3f8   :  { %1401 = vmatprep.subr.bf16.mxu1 %v1400_v24 }
 0x3f9   :  { %1403 = vmatpush3.bf16.msra.mxu1 %v1400_v24 }
 0x3fd   :  { %1281 = vmatmul.mubr.msk.f32.gmra.mrb[4].mxu0 %vm551_vm3, %v635_v26 }
 0x408   :  { %v620_v27 = vpop.xlane.xlu0 %619 }
 0x409   :  { %1482 = vrcp.f32 %v620_v27 }
 0x411   :  { %v623_v28 = vpop.xlane.xlu1 %622 }
 0x412   :  { %1484 = vrcp.f32 %v623_v28 }
 0x413   :  { %v1483_v29 = vpop.eup %1482 }
 0x414   :  { %v637_v30 = vmul.f32 %v1483_v29, %v1467_v60 }
 0x416   :  { %1283 = vmatprep.mubr.msk.f32.mxu0 %vm551_vm3, %v637_v30 }
 0x41c   :  { %v1485_v31 = vpop.eup %1484 }
 0x41d   :  { %v639_v32 = vmul.f32 %v1485_v31, %v1469_v62 }
 0x41f   :  { %1284 = vmatmul.mubr.msk.f32.gmra.mrb[4].mxu0 %vm551_vm3, %v639_v32  ;;  %v1126_v32 = vld [vmem:[%s2017_s10] ss:$0 sm:$0xff] }
 0x4f2   :  { %v1285_v33 = vpop.f32.mrb[4].mxu0 }
 0x4f3   :  { %v1932_v34 = vadd.f32 %v1285_v33, %v1822_v13  ;;  %v760_v35 = vpop.f32.mrb[5].mxu0 }
 0x4f4   :  { %v775_v36 = vadd.f32 %v760_v35, %v1804_v5  ;;  %v1380_v5 = vpack.c.bf16 %v829_v43, %v828_v42 }
 0x4f5   :  { %v782_v37 = vsel %vm117_vm0, %v1932_v34, 0.0  ;;  %v789_v41 = vmul.f32 %v1932_v34, %v1932_v34 }
 0x4f6   :  { %783 = vadd.xlane.f32.xlu0 %v782_v37  ;;  %v788_v38 = vmul.f32 %v775_v36, %v775_v36  ;;  %v779_v40 = vsel %vm117_vm0, %v775_v36, 0.0  ;;  %1381 = vmatprep.subr.bf16.mxu0 %v1380_v5 }
 0x4f7   :  { %v793_v13 = vsel %vm117_vm0, %v789_v41, 0.0  ;;  %1383 = vmatpush3.bf16.msra.mxu0 %v1380_v5 }
 0x4f8   :  { %v790_v39 = vsel %vm117_vm0, %v788_v38, 0.0  ;;  %1385 = vmatprep.subr.bf16.mxu0 %v1384_v46 }
 0x4f9   :  { %791 = vadd.xlane.f32.xlu1 %v790_v39 }
 0x4fa   :  { %780 = vadd.xlane.f32.xlu0 %v779_v40 }
 0x4fb   :  { %1387 = vmatpush3.bf16.msra.mxu0 %v1384_v46 }
 0x4fe   :  { %794 = vadd.xlane.f32.xlu0 %v793_v13 }
 0x583   :  { %v784_v57 = vpop.xlane.xlu0 %783 }
 0x584   :  { %v787_v60 = vmul.f32 0.03125, %v784_v57 }
 0x586   :  { %v792_v58 = vpop.xlane.xlu1 %791  ;;  %v799_v1 = vmul.f32 %v787_v60, %v787_v60  ;;  %v805_v12 = vsub.f32 %v1932_v34, %v787_v60 }
 0x587   :  { %v781_v59 = vpop.xlane.xlu0 %780  ;;  %v796_v62 = vmul.f32 0.03125, %v792_v58 }
 0x588   :  { %v786_v61 = vmul.f32 0.03125, %v781_v59 }
 0x58a   :  { %v798_v63 = vmul.f32 %v786_v61, %v786_v61  ;;  %v804_v9 = vsub.f32 %v775_v36, %v786_v61 }
 0x58b   :  { %v795_v0 = vpop.xlane.xlu0 %794 }
 0x58c   :  { %v800_v47 = vsub.f32 %v796_v62, %v798_v63  ;;  %v797_v2 = vmul.f32 0.03125, %v795_v0  ;;  %v1129_v63 = vld [vmem:[%s2018_s11] ss:$0 sm:$0xff] }
 0x58e   :  { %v802_v3 = vmax.f32 %v800_v47, 0.0  ;;  %v801_v4 = vsub.f32 %v797_v2, %v799_v1  ;;  %v1130_v47 = vld [vmem:[%s2019_s12] ss:$0 sm:$0xff] }
 0x590   :  { %v806_v6 = vadd.f32 1e-06, %v802_v3  ;;  %v803_v7 = vmax.f32 %v801_v4, 0.0 }
 0x592   :  { %1486 = vrsqrt.f32 %v806_v6  ;;  %v807_v8 = vadd.f32 1e-06, %v803_v7 }
 0x594   :  { %1488 = vrsqrt.f32 %v807_v8 }
 0x59c   :  { %v1487_v10 = vpop.eup %1486 }
 0x59d   :  { %v810_v14 = vmul.f32 %v1487_v10, %v804_v9 }
 0x59e   :  { %v1489_v15 = vpop.eup %1488 }
 0x59f   :  { %v818_v17 = vmul.f32 %v1121_v11, %v810_v14  ;;  %v811_v18 = vmul.f32 %v1489_v15, %v805_v12 }
 0x5a1   :  { %v819_v19 = vmul.f32 %v1121_v11, %v811_v18  ;;  %v826_v20 = vadd.f32 %v1122_v16, %v818_v17 }
 0x5a3   :  { %v827_v21 = vadd.f32 %v1122_v16, %v819_v19  ;;  %1294 = vmatprep.mubr.msk.f32.mxu0 %vm117_vm0, %v826_v20 }
 0x5a5   :  { %1295 = vmatmul.mubr.msk.f32.vlgmr.msra.gmra.mrb[6].mxu0 %vm117_vm0, %v827_v21 }
 0x678   :  { %v1296_v26 = vpop.f32.mrb[6].mxu0 }
 0x679   :  { %v917_v27 = vadd.f32 %v1296_v26, %v1123_v25  ;;  %v911_v28 = vpop.f32.mrb[7].mxu0 }
 0x67a   :  { %v912_v29 = vadd.f32 %v1123_v25, %v911_v28 }
 0x67b   :  { %v921_v31 = vmax.f32 %v917_v27, 0.0 }
 0x67c   :  { %v920_v30 = vmax.f32 %v912_v29, 0.0 }
 0x67e   :  { %1313 = vmatprep.mubr.msk.f32.mxu1 %vm551_vm3, %v920_v30 }
 0x67f   :  { %1314 = vmatmul.mubr.msk.f32.vlgmr.msra.gmra.mrb[10].mxu1 %vm551_vm3, %v921_v31 }
 0x752   :  { %v1315_v33 = vpop.f32.mrb[10].mxu1 }
 0x753   :  { %v1015_v34 = vadd.f32 %v1315_v33, %v1126_v32  ;;  %v1009_v35 = vpop.f32.mrb[11].mxu1 }
 0x754   :  { %v1010_v36 = vadd.f32 %v1126_v32, %v1009_v35 }
 0x755   :  { %v1019_v37 = vadd.f32 %v1015_v34, %v827_v21 }
 0x756   :  { %v1018_v38 = vadd.f32 %v1010_v36, %v826_v20 }
 0x757   :  { %v1025_v39 = vsel %vm117_vm0, %v1019_v37, 0.0  ;;  %v1031_v40 = vmul.f32 %v1019_v37, %v1019_v37 }
 0x758   :  { %1026 = vadd.xlane.f32.xlu0 %v1025_v39  ;;  %v1022_v41 = vsel %vm117_vm0, %v1018_v38, 0.0  ;;  %v1030_v13 = vmul.f32 %v1018_v38, %v1018_v38 }
 0x759   :  { %1023 = vadd.xlane.f32.xlu1 %v1022_v41  ;;  %v1035_v42 = vsel %vm117_vm0, %v1031_v40, 0.0 }
 0x75a   :  { %v1032_v43 = vsel %vm117_vm0, %v1030_v13, 0.0 }
 0x75c   :  { %1036 = vadd.xlane.f32.xlu0 %v1035_v42 }
 0x75d   :  { %1033 = vadd.xlane.f32.xlu1 %v1032_v43 }
 0x7e5   :  { %v1027_v5 = vpop.xlane.xlu0 %1026 }
 0x7e6   :  { %v1029_v44 = vmul.f32 0.03125, %v1027_v5  ;;  %v1024_v45 = vpop.xlane.xlu1 %1023 }
 0x7e7   :  { %v1028_v46 = vmul.f32 0.03125, %v1024_v45 }
 0x7e8   :  { %v1041_v49 = vmul.f32 %v1029_v44, %v1029_v44  ;;  %v1047_v60 = vsub.f32 %v1019_v37, %v1029_v44 }
 0x7e9   :  { %v1037_v48 = vpop.xlane.xlu0 %1036  ;;  %v1040_v52 = vmul.f32 %v1028_v46, %v1028_v46  ;;  %v1046_v62 = vsub.f32 %v1018_v38, %v1028_v46 }
 0x7ea   :  { %v1039_v50 = vmul.f32 0.03125, %v1037_v48  ;;  %v1034_v51 = vpop.xlane.xlu1 %1033 }
 0x7eb   :  { %v1038_v53 = vmul.f32 0.03125, %v1034_v51 }
 0x7ec   :  { %v1043_v54 = vsub.f32 %v1039_v50, %v1041_v49 }
 0x7ed   :  { %v1042_v55 = vsub.f32 %v1038_v53, %v1040_v52 }
 0x7ee   :  { %v1045_v56 = vmax.f32 %v1043_v54, 0.0 }
 0x7ef   :  { %v1044_v57 = vmax.f32 %v1042_v55, 0.0 }
 0x7f0   :  { %v1049_v58 = vadd.f32 1e-06, %v1045_v56 }
 0x7f1   :  { %v1048_v59 = vadd.f32 1e-06, %v1044_v57 }
 0x7f2   :  { %1490 = vrsqrt.f32 %v1049_v58 }
 0x7f3   :  { %1492 = vrsqrt.f32 %v1048_v59 }
 0x7fc   :  { %v1491_v61 = vpop.eup %1490 }
 0x7fd   :  { %v1493_v0 = vpop.eup %1492  ;;  %v1053_v1 = vmul.f32 %v1491_v61, %v1047_v60 }
 0x7fe   :  { %v1052_v2 = vmul.f32 %v1493_v0, %v1046_v62 }
 0x7ff   :  { %v1061_v3 = vmul.f32 %v1129_v63, %v1053_v1 }
 0x800   :  { %v1060_v4 = vmul.f32 %v1129_v63, %v1052_v2 }
 0x801   :  { %v1069_v6 = vadd.f32 %v1130_v47, %v1061_v3 }
 0x802   :  { %v1068_v7 = vadd.f32 %v1130_v47, %v1060_v4 }
 0x803   :  { %1071 = vst.msk [vmem:[#allocation11 + $0x8] sm:$0xff] %vm117_vm0, %v1069_v6 }
 0x804   :  { %1070 = vst.msk [vmem:[#allocation11] sm:$0xff] %vm117_vm0, %v1068_v7 }
 0x805   :  { %1615 = shalt.err (!%p1612_p2)
}
 0x806   :  { %s1616_s14 = scalar_lea.hbm %s2020_s13, 256 }
 0x807   :  { %p1617_p3 = scmp.ne.s32.totalorder %s2020_s13, %s1616_s14  ;;  %p1620_p4 = scmp.lt.u32.totalorder %s1616_s14, %s2020_s13 }
 0x809   :  { %p1622_p5 = pnand %p1620_p4, %p1617_p3 }
 0x80b   :  { %1625 = shalt.err (!%p1622_p5)
}
 0x80c   :  { %1083 = dma.vmem_to_hbm [thread:$0]  %s1078_s29, 256, %s2020_s13, [#allocation4], %s1636_s20, %s1636_s20, %s1637_s21  }
 0x80d   :  { %1632 = dma.done.wait [#allocation4], 256  }
 0x80e   :  { %1633 = vsyncadd [#allocation4], 4294967040 }
 0x80f   :  { %1087 = vsyncpa [#allocation3], 1 }
 0x810   :  { %1088 = vsyncpa [#allocation6], 1 }
 0x811   :  { %1089 = vsyncpa [#allocation9], 1 }
 0x812   :  { %1090 = vsyncpa [#allocation4], 1 }

</bundles_post_ra>
